<compile_context>
chip_gen: v5e
topology: v5e:2x2
jax: 0.10.0
libtpu: 0.0.40
codegen_flags: <defaults>
</compile_context>

<pallas_src>
import functools
from math import sqrt

import jax
import jax.numpy as jnp
import numpy as np
from jax import lax
from jax.experimental import pallas as pl
from jax.experimental.pallas import tpu as pltpu


# ------------------------------ tiling helpers ------------------------------ #

def _pick_tile(dim, cap, align):
    """Largest multiple of `align` that divides `dim` and is <= cap, else `dim`.

    Returning a divisor (or the full dim) keeps every grid block full-sized, so
    K-axis accumulation never sees padded garbage and edge masking is avoided.
    """
    if dim <= cap:
        return dim
    t = (cap // align) * align
    while t >= align:
        if dim % t == 0:
            return t
        t -= align
    return dim


# --------------------------- tiled linear kernel ---------------------------- #

def _linear_kernel(x_ref, w_ref, b_ref, o_ref, acc_ref):
    # y = x @ W_t + b, accumulated over the K grid axis in f32 VMEM scratch.
    k = pl.program_id(2)

    @pl.when(k == 0)
    def _():
        acc_ref[...] = jnp.zeros_like(acc_ref)

    acc_ref[...] += jnp.dot(x_ref[...], w_ref[...],
                            preferred_element_type=jnp.float32)

    @pl.when(k == pl.num_programs(2) - 1)
    def _():
        o_ref[...] = (acc_ref[...] + b_ref[...]).astype(o_ref.dtype)


def pallas_linear(x, w_t, b, *, tm_cap=256, tn_cap=512, tk_cap=512):
    """x: (M, K), w_t: (K, N) (already transposed), b: (N,) -> (M, N) f32."""
    m, kdim = x.shape
    n = w_t.shape[1]
    tm = _pick_tile(m, tm_cap, 8)
    tn = _pick_tile(n, tn_cap, 128)
    tk = _pick_tile(kdim, tk_cap, 128)
    grid = (m // tm, n // tn, kdim // tk)
    return pl.pallas_call(
        _linear_kernel,
        out_shape=jax.ShapeDtypeStruct((m, n), jnp.float32),
        grid_spec=pltpu.PrefetchScalarGridSpec(
            num_scalar_prefetch=0,
            grid=grid,
            in_specs=[
                pl.BlockSpec((tm, tk), lambda i, j, k: (i, k)),
                pl.BlockSpec((tk, tn), lambda i, j, k: (k, j)),
                pl.BlockSpec((1, tn), lambda i, j, k: (0, j)),
            ],
            out_specs=pl.BlockSpec((tm, tn), lambda i, j, k: (i, j)),
            scratch_shapes=[pltpu.VMEM((tm, tn), jnp.float32)],
        ),
        compiler_params=pltpu.CompilerParams(
            dimension_semantics=("parallel", "parallel", "arbitrary"),
            vmem_limit_bytes=32 * 1024 * 1024,   # tiles sized to fit v7x budget
        ),
    )(x, w_t, b.reshape(1, n))


# ---------- fused Q-projection + reprogramming attention + out-proj --------- #

def _fused_attn_kernel(x_ref, k_ref, v_ref, wq_ref, bq_ref, wo_ref, bo_ref,
                       o_ref, q_scr, ctx_scr, *, n_heads):
    # Q projection for this row tile; 1/sqrt(E) is pre-folded into wq/bq.
    q_scr[...] = (jnp.dot(x_ref[...], wq_ref[...],
                          preferred_element_type=jnp.float32) + bq_ref[...])

    dk = q_scr.shape[-1]
    e = dk // n_heads
    for h in range(n_heads):                      # static unroll over heads
        qh = q_scr[:, h * e:(h + 1) * e]          # (tm, E)
        kh = k_ref[:, h * e:(h + 1) * e]          # (S,  E)
        vh = v_ref[:, h * e:(h + 1) * e]          # (S,  E)

        # scores = qh @ kh^T: contract over E without materializing a transpose.
        scores = lax.dot_general(qh, kh, (((1,), (1,)), ((), ())),
                                 preferred_element_type=jnp.float32)  # (tm, S)

        # numerically stable softmax over S; reciprocal on the EUP slot.
        m = jnp.max(scores, axis=-1, keepdims=True)
        p = jnp.exp(scores - m)
        a = p * pl.reciprocal(jnp.sum(p, axis=-1, keepdims=True), approx=True)

        ctx_scr[:, h * e:(h + 1) * e] = jnp.dot(
            a, vh, preferred_element_type=jnp.float32)

    # Output projection; store is lane-dense (tm, d_llm).
    o_ref[...] = (jnp.dot(ctx_scr[...], wo_ref[...],
                          preferred_element_type=jnp.float32)
                  + bo_ref[...]).astype(o_ref.dtype)


def pallas_reprogramming_fused(x2d, k_proj, v_proj, wq_t, bq, wo_t, bo,
                               *, n_heads, tm_cap=256):
    """x2d: (M, d_model), k_proj/v_proj: (S, dk), wq_t: (d_model, dk),
    wo_t: (dk, d_llm) -> (M, d_llm)."""
    m, d_model = x2d.shape
    s, dk = k_proj.shape
    d_llm = wo_t.shape[1]
    tm = _pick_tile(m, tm_cap, 8)
    grid = (m // tm,)
    kernel = functools.partial(_fused_attn_kernel, n_heads=n_heads)
    return pl.pallas_call(
        kernel,
        out_shape=jax.ShapeDtypeStruct((m, d_llm), jnp.float32),
        grid_spec=pltpu.PrefetchScalarGridSpec(
            num_scalar_prefetch=0,
            grid=grid,
            in_specs=[
                pl.BlockSpec((tm, d_model), lambda i: (i, 0)),  # row tile
                pl.BlockSpec((s, dk), lambda i: (0, 0)),        # K (resident)
                pl.BlockSpec((s, dk), lambda i: (0, 0)),        # V (resident)
                pl.BlockSpec((d_model, dk), lambda i: (0, 0)),  # Wq^T (scaled)
                pl.BlockSpec((1, dk), lambda i: (0, 0)),        # bq  (scaled)
                pl.BlockSpec((dk, d_llm), lambda i: (0, 0)),    # Wo^T
                pl.BlockSpec((1, d_llm), lambda i: (0, 0)),     # bo
            ],
            out_specs=pl.BlockSpec((tm, d_llm), lambda i: (i, 0)),
            scratch_shapes=[
                pltpu.VMEM((tm, dk), jnp.float32),   # Q tile
                pltpu.VMEM((tm, dk), jnp.float32),   # per-head context
            ],
        ),
        compiler_params=pltpu.CompilerParams(
            dimension_semantics=("parallel",),       # shards row tiles over TCs
            vmem_limit_bytes=32 * 1024 * 1024,
        ),
    )(x2d, k_proj, v_proj, wq_t, bq.reshape(1, dk), wo_t, bo.reshape(1, d_llm))


# ------------------------------ Module wrapper ------------------------------ #

def init_params(key, d_model, n_heads, d_llm, d_keys=None):
    d_keys = d_keys or d_model // n_heads
    dk = d_keys * n_heads
    ks = jax.random.split(key, 8)

    def lin(kw, kb, out_f, in_f):
        bound = 1.0 / sqrt(in_f)
        w = jax.random.uniform(kw, (out_f, in_f), jnp.float32, -bound, bound)
        b = jax.random.uniform(kb, (out_f,), jnp.float32, -bound, bound)
        return w, b

    wq, bq = lin(ks[0], ks[1], dk, d_model)
    wk, bk = lin(ks[2], ks[3], dk, d_llm)
    wv, bv = lin(ks[4], ks[5], dk, d_llm)
    wo, bo = lin(ks[6], ks[7], d_llm, dk)
    return dict(wq=wq, bq=bq, wk=wk, bk=bk, wv=wv, bv=bv, wo=wo, bo=bo)


@functools.partial(jax.jit, static_argnames=("n_heads",))
def reprogramming_layer_forward(params, target_embedding, source_embedding,
                                value_embedding, n_heads):
    B, L, d_model = target_embedding.shape
    S, d_llm = source_embedding.shape
    H = n_heads
    dk = params["wq"].shape[0]
    E = dk // H
    scale = 1.0 / sqrt(E)

    # One-time weight relayout: (out,in) -> (in,out) so kernels never do W.T;
    # fold the 1/sqrt(E) attention scale into the Q projection.
    wq_t = params["wq"].T * scale
    bq_s = params["bq"] * scale
    wk_t = params["wk"].T
    wv_t = params["wv"].T
    wo_t = params["wo"].T

    # K / V projections: tiled Pallas linear kernels.
    k_proj = pallas_linear(source_embedding, wk_t, params["bk"])  # (S, dk)
    v_proj = pallas_linear(value_embedding, wv_t, params["bv"])   # (S, dk)

    # Fused Q-projection + multi-head reprogramming attention + out-projection.
    x2d = target_embedding.reshape(B * L, d_model)
    out = pallas_reprogramming_fused(x2d, k_proj, v_proj, wq_t, bq_s,
                                     wo_t, params["bo"], n_heads=H)
    return out.reshape(B, L, d_llm)


# ------------------------------ Reference (JAX) ----------------------------- #

def reference_forward(params, target, source, value, n_heads):
    B, L, d_model = target.shape
    S, d_llm = source.shape
    H = n_heads

    q = target.reshape(B * L, d_model) @ params["wq"].T + params["bq"]
    k = source @ params["wk"].T + params["bk"]
    v = value @ params["wv"].T + params["bv"]
    E = q.shape[-1] // H
    q = q.reshape(B, L, H, E)
    k = k.reshape(S, H, E)
    v = v.reshape(S, H, E)

    scale = 1.0 / sqrt(E)
    scores = jnp.einsum("blhe,she->bhls", q, k)
    a = jax.nn.softmax(scale * scores, axis=-1)
    rep = jnp.einsum("bhls,she->blhe", a, v)
    out = rep.reshape(B * L, H * E) @ params["wo"].T + params["bo"]
    return out.reshape(B, L, d_llm)


# ---------------------------------- main ------------------------------------ #

if __name__ == "__main__":
    B, L, S = 2, 8, 16
    d_model, n_heads, d_llm = 32, 4, 64

    key = jax.random.PRNGKey(0)
    kp, kt, ks, kv = jax.random.split(key, 4)

    params = init_params(kp, d_model, n_heads, d_llm)
    target = jax.random.normal(kt, (B, L, d_model), jnp.float32)
    source = jax.random.normal(ks, (S, d_llm), jnp.float32)
    value = jax.random.normal(kv, (S, d_llm), jnp.float32)

    out = reprogramming_layer_forward(params, target, source, value, n_heads)
    out = jax.block_until_ready(out)

    ref = reference_forward(params, target, source, value, n_heads)
    # Tolerance relaxed slightly vs strict f32 because the softmax denominator
    # uses the EUP approximate reciprocal (pl.reciprocal(approx=True)).
    np.testing.assert_allclose(np.asarray(out), np.asarray(ref),
                               rtol=1e-2, atol=1e-2)

    assert out.shape == (B, L, d_llm)
    print("KERNEL_OK")
</pallas_src>

<mosaic_0001>
module attributes {stable_mosaic.version = 11 : i64} {
  func.func @_linear_kernel(%arg0: i32, %arg1: i32, %arg2: i32, %arg3: memref<16x64xf32, #tpu.memory_space<vmem>>, %arg4: memref<64x32xf32, #tpu.memory_space<vmem>>, %arg5: memref<1x32xf32, #tpu.memory_space<vmem>>, %arg6: memref<16x32xf32, #tpu.memory_space<vmem>>, %arg7: memref<16x32xf32, #tpu.memory_space<vmem>>) attributes {dimension_semantics = [#tpu.dimension_semantics<parallel>, #tpu.dimension_semantics<parallel>, #tpu.dimension_semantics<arbitrary>], iteration_bounds = array<i64: 1, 1, 1>, scalar_prefetch = 0 : i64, scratch_operands = 1 : i64, tpu.core_type = #tpu.core_type<tc>, window_params = [{transform_indices = @transform_0, window_bounds = array<i64: 16, 64>}, {transform_indices = @transform_1, window_bounds = array<i64: 64, 32>}, {transform_indices = @transform_2, window_bounds = array<i64: 1, 32>}, {transform_indices = @transform_3, window_bounds = array<i64: 16, 32>}]} {
    %c0_i32 = arith.constant 0 : i32
    %0 = arith.cmpi eq, %arg2, %c0_i32 : i32
    %1 = arith.extui %0 : i1 to i32
    %c0_i32_0 = arith.constant 0 : i32
    %2 = arith.cmpi ne, %1, %c0_i32_0 : i32
    scf.if %2 {
      %cst_10 = arith.constant 0.000000e+00 : f32
      %12 = vector.broadcast %cst_10 : f32 to vector<16x32xf32>
      %c0_11 = arith.constant 0 : index
      %c0_12 = arith.constant 0 : index
      %13 = vector.load %arg7[%c0_11, %c0_12] : memref<16x32xf32, #tpu.memory_space<vmem>>, vector<16x32xf32>
      tpu.vector_store %arg7[%c0_11, %c0_12], %12 {strides = array<i32>} : memref<16x32xf32, #tpu.memory_space<vmem>>, vector<16x32xf32>,
    } else {
    }
    %c0 = arith.constant 0 : index
    %c0_1 = arith.constant 0 : index
    %3 = vector.load %arg7[%c0, %c0_1] : memref<16x32xf32, #tpu.memory_space<vmem>>, vector<16x32xf32>
    %c0_2 = arith.constant 0 : index
    %c0_3 = arith.constant 0 : index
    %4 = vector.load %arg3[%c0_2, %c0_3] : memref<16x64xf32, #tpu.memory_space<vmem>>, vector<16x64xf32>
    %c0_4 = arith.constant 0 : index
    %c0_5 = arith.constant 0 : index
    %5 = vector.load %arg4[%c0_4, %c0_5] : memref<64x32xf32, #tpu.memory_space<vmem>>, vector<64x32xf32>
    %cst = arith.constant dense<0.000000e+00> : vector<16x32xf32>
    %6 = tpu.matmul %4, %5, %cst {dimension_numbers = #tpu.dot_dimension_numbers<[1], [0], [0], [1], [0, 0, 1, 1], [], []>} : vector<16x64xf32>, vector<64x32xf32>, vector<16x32xf32> -> vector<16x32xf32>
    %7 = arith.addf %3, %6 : vector<16x32xf32>
    %c0_6 = arith.constant 0 : index
    %c0_7 = arith.constant 0 : index
    %8 = vector.load %arg7[%c0_6, %c0_7] : memref<16x32xf32, #tpu.memory_space<vmem>>, vector<16x32xf32>
    tpu.vector_store %arg7[%c0_6, %c0_7], %7 {strides = array<i32>} : memref<16x32xf32, #tpu.memory_space<vmem>>, vector<16x32xf32>,
    %c0_i32_8 = arith.constant 0 : i32
    %9 = arith.cmpi eq, %arg2, %c0_i32_8 : i32
    %10 = arith.extui %9 : i1 to i32
    %c0_i32_9 = arith.constant 0 : i32
    %11 = arith.cmpi ne, %10, %c0_i32_9 : i32
    scf.if %11 {
      %c0_10 = arith.constant 0 : index
      %c0_11 = arith.constant 0 : index
      %12 = vector.load %arg7[%c0_10, %c0_11] : memref<16x32xf32, #tpu.memory_space<vmem>>, vector<16x32xf32>
      %c0_12 = arith.constant 0 : index
      %c0_13 = arith.constant 0 : index
      %13 = vector.load %arg5[%c0_12, %c0_13] : memref<1x32xf32, #tpu.memory_space<vmem>>, vector<1x32xf32>
      %14 = vector.broadcast %13 : vector<1x32xf32> to vector<16x32xf32>
      %15 = arith.addf %12, %14 : vector<16x32xf32>
      %c0_14 = arith.constant 0 : index
      %c0_15 = arith.constant 0 : index
      %16 = vector.load %arg6[%c0_14, %c0_15] : memref<16x32xf32, #tpu.memory_space<vmem>>, vector<16x32xf32>
      tpu.vector_store %arg6[%c0_14, %c0_15], %15 {strides = array<i32>} : memref<16x32xf32, #tpu.memory_space<vmem>>, vector<16x32xf32>,
    } else {
    }
    return
  }
  func.func @transform_0(%arg0: i32, %arg1: i32, %arg2: i32) -> (i32, i32) {
    %c0_i32 = arith.constant 0 : i32
    return %arg0, %arg2 : i32, i32
  }
  func.func @transform_1(%arg0: i32, %arg1: i32, %arg2: i32) -> (i32, i32) {
    %c0_i32 = arith.constant 0 : i32
    return %arg2, %arg1 : i32, i32
  }
  func.func @transform_2(%arg0: i32, %arg1: i32, %arg2: i32) -> (i32, i32) {
    %c0_i32 = arith.constant 0 : i32
    %c0_i32_0 = arith.constant 0 : i32
    return %c0_i32, %arg1 : i32, i32
  }
  func.func @transform_3(%arg0: i32, %arg1: i32, %arg2: i32) -> (i32, i32) {
    %c0_i32 = arith.constant 0 : i32
    return %arg0, %arg1 : i32, i32
  }
}

module attributes {stable_mosaic.version = 11 : i64} {
  func.func @_fused_attn_kernel(%arg0: i32, %arg1: memref<16x32xf32, #tpu.memory_space<vmem>>, %arg2: memref<16x32xf32, #tpu.memory_space<vmem>>, %arg3: memref<16x32xf32, #tpu.memory_space<vmem>>, %arg4: memref<32x32xf32, #tpu.memory_space<vmem>>, %arg5: memref<1x32xf32, #tpu.memory_space<vmem>>, %arg6: memref<32x64xf32, #tpu.memory_space<vmem>>, %arg7: memref<1x64xf32, #tpu.memory_space<vmem>>, %arg8: memref<16x64xf32, #tpu.memory_space<vmem>>, %arg9: memref<16x32xf32, #tpu.memory_space<vmem>>, %arg10: memref<16x32xf32, #tpu.memory_space<vmem>>) attributes {dimension_semantics = [#tpu.dimension_semantics<parallel>], iteration_bounds = array<i64: 1>, scalar_prefetch = 0 : i64, scratch_operands = 2 : i64, tpu.core_type = #tpu.core_type<tc>, window_params = [{transform_indices = @transform_0, window_bounds = array<i64: 16, 32>}, {pipeline_mode = #tpu.pipeline_mode<synchronous>, transform_indices = @transform_1, window_bounds = array<i64: 16, 32>}, {pipeline_mode = #tpu.pipeline_mode<synchronous>, transform_indices = @transform_2, window_bounds = array<i64: 16, 32>}, {pipeline_mode = #tpu.pipeline_mode<synchronous>, transform_indices = @transform_3, window_bounds = array<i64: 32, 32>}, {pipeline_mode = #tpu.pipeline_mode<synchronous>, transform_indices = @transform_4, window_bounds = array<i64: 1, 32>}, {pipeline_mode = #tpu.pipeline_mode<synchronous>, transform_indices = @transform_5, window_bounds = array<i64: 32, 64>}, {pipeline_mode = #tpu.pipeline_mode<synchronous>, transform_indices = @transform_6, window_bounds = array<i64: 1, 64>}, {transform_indices = @transform_7, window_bounds = array<i64: 16, 64>}]} {
    %c0 = arith.constant 0 : index
    %c0_0 = arith.constant 0 : index
    %0 = vector.load %arg1[%c0, %c0_0] : memref<16x32xf32, #tpu.memory_space<vmem>>, vector<16x32xf32>
    %c0_1 = arith.constant 0 : index
    %c0_2 = arith.constant 0 : index
    %1 = vector.load %arg4[%c0_1, %c0_2] : memref<32x32xf32, #tpu.memory_space<vmem>>, vector<32x32xf32>
    %cst = arith.constant dense<0.000000e+00> : vector<16x32xf32>
    %2 = tpu.matmul %0, %1, %cst {dimension_numbers = #tpu.dot_dimension_numbers<[1], [0], [0], [1], [0, 0, 1, 1], [], []>} : vector<16x32xf32>, vector<32x32xf32>, vector<16x32xf32> -> vector<16x32xf32>
    %c0_3 = arith.constant 0 : index
    %c0_4 = arith.constant 0 : index
    %3 = vector.load %arg5[%c0_3, %c0_4] : memref<1x32xf32, #tpu.memory_space<vmem>>, vector<1x32xf32>
    %4 = vector.broadcast %3 : vector<1x32xf32> to vector<16x32xf32>
    %5 = arith.addf %2, %4 : vector<16x32xf32>
    %c0_5 = arith.constant 0 : index
    %c0_6 = arith.constant 0 : index
    %6 = vector.load %arg9[%c0_5, %c0_6] : memref<16x32xf32, #tpu.memory_space<vmem>>, vector<16x32xf32>
    tpu.vector_store %arg9[%c0_5, %c0_6], %5 {strides = array<i32>} : memref<16x32xf32, #tpu.memory_space<vmem>>, vector<16x32xf32>,
    %c0_7 = arith.constant 0 : index
    %c0_8 = arith.constant 0 : index
    %7 = vector.load %arg9[%c0_7, %c0_8] : memref<16x32xf32, #tpu.memory_space<vmem>>, vector<16x8xf32>
    %c0_9 = arith.constant 0 : index
    %c0_10 = arith.constant 0 : index
    %8 = vector.load %arg2[%c0_9, %c0_10] : memref<16x32xf32, #tpu.memory_space<vmem>>, vector<16x8xf32>
    %c0_11 = arith.constant 0 : index
    %c0_12 = arith.constant 0 : index
    %9 = vector.load %arg3[%c0_11, %c0_12] : memref<16x32xf32, #tpu.memory_space<vmem>>, vector<16x8xf32>
    %cst_13 = arith.constant dense<0.000000e+00> : vector<16x16xf32>
    %10 = tpu.matmul %7, %8, %cst_13 {dimension_numbers = #tpu.dot_dimension_numbers<[1], [1], [0], [0], [0, 0, 1, 0], [], []>} : vector<16x8xf32>, vector<16x8xf32>, vector<16x16xf32> -> vector<16x16xf32>
    %cst_14 = arith.constant dense<0xFF800000> : vector<16xf32>
    %11 = vector.multi_reduction <maximumf>, %10, %cst_14 [1] : vector<16x16xf32> to vector<16xf32>
    %12 = vector.shape_cast %11 : vector<16xf32> to vector<16x1xf32>
    %13 = vector.broadcast %12 : vector<16x1xf32> to vector<16x16xf32>
    %14 = arith.subf %10, %13 : vector<16x16xf32>
    %15 = math.exp %14 : vector<16x16xf32>
    %cst_15 = arith.constant dense<0.000000e+00> : vector<16xf32>
    %16 = vector.multi_reduction <add>, %15, %cst_15 [1] : vector<16x16xf32> to vector<16xf32>
    %17 = vector.shape_cast %16 : vector<16xf32> to vector<16x1xf32>
    %18 = tpu.reciprocal %17 {approx = true} : vector<16x1xf32> -> vector<16x1xf32>
    %19 = vector.broadcast %18 : vector<16x1xf32> to vector<16x16xf32>
    %20 = arith.mulf %15, %19 : vector<16x16xf32>
    %cst_16 = arith.constant dense<0.000000e+00> : vector<16x8xf32>
    %21 = tpu.matmul %20, %9, %cst_16 {dimension_numbers = #tpu.dot_dimension_numbers<[1], [0], [0], [1], [0, 0, 1, 1], [], []>} : vector<16x16xf32>, vector<16x8xf32>, vector<16x8xf32> -> vector<16x8xf32>
    %c0_17 = arith.constant 0 : index
    %c0_18 = arith.constant 0 : index
    %22 = vector.load %arg10[%c0_17, %c0_18] : memref<16x32xf32, #tpu.memory_space<vmem>>, vector<16x8xf32>
    tpu.vector_store %arg10[%c0_17, %c0_18], %21 {strides = array<i32>} : memref<16x32xf32, #tpu.memory_space<vmem>>, vector<16x8xf32>,
    %c0_19 = arith.constant 0 : index
    %c8 = arith.constant 8 : index
    %23 = vector.load %arg9[%c0_19, %c8] : memref<16x32xf32, #tpu.memory_space<vmem>>, vector<16x8xf32>
    %c0_20 = arith.constant 0 : index
    %c8_21 = arith.constant 8 : index
    %24 = vector.load %arg2[%c0_20, %c8_21] : memref<16x32xf32, #tpu.memory_space<vmem>>, vector<16x8xf32>
    %c0_22 = arith.constant 0 : index
    %c8_23 = arith.constant 8 : index
    %25 = vector.load %arg3[%c0_22, %c8_23] : memref<16x32xf32, #tpu.memory_space<vmem>>, vector<16x8xf32>
    %cst_24 = arith.constant dense<0.000000e+00> : vector<16x16xf32>
    %26 = tpu.matmul %23, %24, %cst_24 {dimension_numbers = #tpu.dot_dimension_numbers<[1], [1], [0], [0], [0, 0, 1, 0], [], []>} : vector<16x8xf32>, vector<16x8xf32>, vector<16x16xf32> -> vector<16x16xf32>
    %cst_25 = arith.constant dense<0xFF800000> : vector<16xf32>
    %27 = vector.multi_reduction <maximumf>, %26, %cst_25 [1] : vector<16x16xf32> to vector<16xf32>
    %28 = vector.shape_cast %27 : vector<16xf32> to vector<16x1xf32>
    %29 = vector.broadcast %28 : vector<16x1xf32> to vector<16x16xf32>
    %30 = arith.subf %26, %29 : vector<16x16xf32>
    %31 = math.exp %30 : vector<16x16xf32>
    %cst_26 = arith.constant dense<0.000000e+00> : vector<16xf32>
    %32 = vector.multi_reduction <add>, %31, %cst_26 [1] : vector<16x16xf32> to vector<16xf32>
    %33 = vector.shape_cast %32 : vector<16xf32> to vector<16x1xf32>
    %34 = tpu.reciprocal %33 {approx = true} : vector<16x1xf32> -> vector<16x1xf32>
    %35 = vector.broadcast %34 : vector<16x1xf32> to vector<16x16xf32>
    %36 = arith.mulf %31, %35 : vector<16x16xf32>
    %cst_27 = arith.constant dense<0.000000e+00> : vector<16x8xf32>
    %37 = tpu.matmul %36, %25, %cst_27 {dimension_numbers = #tpu.dot_dimension_numbers<[1], [0], [0], [1], [0, 0, 1, 1], [], []>} : vector<16x16xf32>, vector<16x8xf32>, vector<16x8xf32> -> vector<16x8xf32>
    %c0_28 = arith.constant 0 : index
    %c8_29 = arith.constant 8 : index
    %38 = vector.load %arg10[%c0_28, %c8_29] : memref<16x32xf32, #tpu.memory_space<vmem>>, vector<16x8xf32>
    tpu.vector_store %arg10[%c0_28, %c8_29], %37 {strides = array<i32>} : memref<16x32xf32, #tpu.memory_space<vmem>>, vector<16x8xf32>,
    %c0_30 = arith.constant 0 : index
    %c16 = arith.constant 16 : index
    %39 = vector.load %arg9[%c0_30, %c16] : memref<16x32xf32, #tpu.memory_space<vmem>>, vector<16x8xf32>
    %c0_31 = arith.constant 0 : index
    %c16_32 = arith.constant 16 : index
    %40 = vector.load %arg2[%c0_31, %c16_32] : memref<16x32xf32, #tpu.memory_space<vmem>>, vector<16x8xf32>
    %c0_33 = arith.constant 0 : index
    %c16_34 = arith.constant 16 : index
    %41 = vector.load %arg3[%c0_33, %c16_34] : memref<16x32xf32, #tpu.memory_space<vmem>>, vector<16x8xf32>
    %cst_35 = arith.constant dense<0.000000e+00> : vector<16x16xf32>
    %42 = tpu.matmul %39, %40, %cst_35 {dimension_numbers = #tpu.dot_dimension_numbers<[1], [1], [0], [0], [0, 0, 1, 0], [], []>} : vector<16x8xf32>, vector<16x8xf32>, vector<16x16xf32> -> vector<16x16xf32>
    %cst_36 = arith.constant dense<0xFF800000> : vector<16xf32>
    %43 = vector.multi_reduction <maximumf>, %42, %cst_36 [1] : vector<16x16xf32> to vector<16xf32>
    %44 = vector.shape_cast %43 : vector<16xf32> to vector<16x1xf32>
    %45 = vector.broadcast %44 : vector<16x1xf32> to vector<16x16xf32>
    %46 = arith.subf %42, %45 : vector<16x16xf32>
    %47 = math.exp %46 : vector<16x16xf32>
    %cst_37 = arith.constant dense<0.000000e+00> : vector<16xf32>
    %48 = vector.multi_reduction <add>, %47, %cst_37 [1] : vector<16x16xf32> to vector<16xf32>
    %49 = vector.shape_cast %48 : vector<16xf32> to vector<16x1xf32>
    %50 = tpu.reciprocal %49 {approx = true} : vector<16x1xf32> -> vector<16x1xf32>
    %51 = vector.broadcast %50 : vector<16x1xf32> to vector<16x16xf32>
    %52 = arith.mulf %47, %51 : vector<16x16xf32>
    %cst_38 = arith.constant dense<0.000000e+00> : vector<16x8xf32>
    %53 = tpu.matmul %52, %41, %cst_38 {dimension_numbers = #tpu.dot_dimension_numbers<[1], [0], [0], [1], [0, 0, 1, 1], [], []>} : vector<16x16xf32>, vector<16x8xf32>, vector<16x8xf32> -> vector<16x8xf32>
    %c0_39 = arith.constant 0 : index
    %c16_40 = arith.constant 16 : index
    %54 = vector.load %arg10[%c0_39, %c16_40] : memref<16x32xf32, #tpu.memory_space<vmem>>, vector<16x8xf32>
    tpu.vector_store %arg10[%c0_39, %c16_40], %53 {strides = array<i32>} : memref<16x32xf32, #tpu.memory_space<vmem>>, vector<16x8xf32>,
    %c0_41 = arith.constant 0 : index
    %c24 = arith.constant 24 : index
    %55 = vector.load %arg9[%c0_41, %c24] : memref<16x32xf32, #tpu.memory_space<vmem>>, vector<16x8xf32>
    %c0_42 = arith.constant 0 : index
    %c24_43 = arith.constant 24 : index
    %56 = vector.load %arg2[%c0_42, %c24_43] : memref<16x32xf32, #tpu.memory_space<vmem>>, vector<16x8xf32>
    %c0_44 = arith.constant 0 : index
    %c24_45 = arith.constant 24 : index
    %57 = vector.load %arg3[%c0_44, %c24_45] : memref<16x32xf32, #tpu.memory_space<vmem>>, vector<16x8xf32>
    %cst_46 = arith.constant dense<0.000000e+00> : vector<16x16xf32>
    %58 = tpu.matmul %55, %56, %cst_46 {dimension_numbers = #tpu.dot_dimension_numbers<[1], [1], [0], [0], [0, 0, 1, 0], [], []>} : vector<16x8xf32>, vector<16x8xf32>, vector<16x16xf32> -> vector<16x16xf32>
    %cst_47 = arith.constant dense<0xFF800000> : vector<16xf32>
    %59 = vector.multi_reduction <maximumf>, %58, %cst_47 [1] : vector<16x16xf32> to vector<16xf32>
    %60 = vector.shape_cast %59 : vector<16xf32> to vector<16x1xf32>
    %61 = vector.broadcast %60 : vector<16x1xf32> to vector<16x16xf32>
    %62 = arith.subf %58, %61 : vector<16x16xf32>
    %63 = math.exp %62 : vector<16x16xf32>
    %cst_48 = arith.constant dense<0.000000e+00> : vector<16xf32>
    %64 = vector.multi_reduction <add>, %63, %cst_48 [1] : vector<16x16xf32> to vector<16xf32>
    %65 = vector.shape_cast %64 : vector<16xf32> to vector<16x1xf32>
    %66 = tpu.reciprocal %65 {approx = true} : vector<16x1xf32> -> vector<16x1xf32>
    %67 = vector.broadcast %66 : vector<16x1xf32> to vector<16x16xf32>
    %68 = arith.mulf %63, %67 : vector<16x16xf32>
    %cst_49 = arith.constant dense<0.000000e+00> : vector<16x8xf32>
    %69 = tpu.matmul %68, %57, %cst_49 {dimension_numbers = #tpu.dot_dimension_numbers<[1], [0], [0], [1], [0, 0, 1, 1], [], []>} : vector<16x16xf32>, vector<16x8xf32>, vector<16x8xf32> -> vector<16x8xf32>
    %c0_50 = arith.constant 0 : index
    %c24_51 = arith.constant 24 : index
    %70 = vector.load %arg10[%c0_50, %c24_51] : memref<16x32xf32, #tpu.memory_space<vmem>>, vector<16x8xf32>
    tpu.vector_store %arg10[%c0_50, %c24_51], %69 {strides = array<i32>} : memref<16x32xf32, #tpu.memory_space<vmem>>, vector<16x8xf32>,
    %c0_52 = arith.constant 0 : index
    %c0_53 = arith.constant 0 : index
    %71 = vector.load %arg10[%c0_52, %c0_53] : memref<16x32xf32, #tpu.memory_space<vmem>>, vector<16x32xf32>
    %c0_54 = arith.constant 0 : index
    %c0_55 = arith.constant 0 : index
    %72 = vector.load %arg6[%c0_54, %c0_55] : memref<32x64xf32, #tpu.memory_space<vmem>>, vector<32x64xf32>
    %cst_56 = arith.constant dense<0.000000e+00> : vector<16x64xf32>
    %73 = tpu.matmul %71, %72, %cst_56 {dimension_numbers = #tpu.dot_dimension_numbers<[1], [0], [0], [1], [0, 0, 1, 1], [], []>} : vector<16x32xf32>, vector<32x64xf32>, vector<16x64xf32> -> vector<16x64xf32>
    %c0_57 = arith.constant 0 : index
    %c0_58 = arith.constant 0 : index
    %74 = vector.load %arg7[%c0_57, %c0_58] : memref<1x64xf32, #tpu.memory_space<vmem>>, vector<1x64xf32>
    %75 = vector.broadcast %74 : vector<1x64xf32> to vector<16x64xf32>
    %76 = arith.addf %73, %75 : vector<16x64xf32>
    %c0_59 = arith.constant 0 : index
    %c0_60 = arith.constant 0 : index
    %77 = vector.load %arg8[%c0_59, %c0_60] : memref<16x64xf32, #tpu.memory_space<vmem>>, vector<16x64xf32>
    tpu.vector_store %arg8[%c0_59, %c0_60], %76 {strides = array<i32>} : memref<16x64xf32, #tpu.memory_space<vmem>>, vector<16x64xf32>,
    return
  }
  func.func @transform_0(%arg0: i32) -> (i32, i32) {
    %c0_i32 = arith.constant 0 : i32
    %c0_i32_0 = arith.constant 0 : i32
    return %arg0, %c0_i32 : i32, i32
  }
  func.func @transform_1(%arg0: i32) -> (i32, i32) {
    %c0_i32 = arith.constant 0 : i32
    %c0_i32_0 = arith.constant 0 : i32
    %c0_i32_1 = arith.constant 0 : i32
    return %c0_i32, %c0_i32_0 : i32, i32
  }
  func.func @transform_2(%arg0: i32) -> (i32, i32) {
    %c0_i32 = arith.constant 0 : i32
    %c0_i32_0 = arith.constant 0 : i32
    %c0_i32_1 = arith.constant 0 : i32
    return %c0_i32, %c0_i32_0 : i32, i32
  }
  func.func @transform_3(%arg0: i32) -> (i32, i32) {
    %c0_i32 = arith.constant 0 : i32
    %c0_i32_0 = arith.constant 0 : i32
    %c0_i32_1 = arith.constant 0 : i32
    return %c0_i32, %c0_i32_0 : i32, i32
  }
  func.func @transform_4(%arg0: i32) -> (i32, i32) {
    %c0_i32 = arith.constant 0 : i32
    %c0_i32_0 = arith.constant 0 : i32
    %c0_i32_1 = arith.constant 0 : i32
    return %c0_i32, %c0_i32_0 : i32, i32
  }
  func.func @transform_5(%arg0: i32) -> (i32, i32) {
    %c0_i32 = arith.constant 0 : i32
    %c0_i32_0 = arith.constant 0 : i32
    %c0_i32_1 = arith.constant 0 : i32
    return %c0_i32, %c0_i32_0 : i32, i32
  }
  func.func @transform_6(%arg0: i32) -> (i32, i32) {
    %c0_i32 = arith.constant 0 : i32
    %c0_i32_0 = arith.constant 0 : i32
    %c0_i32_1 = arith.constant 0 : i32
    return %c0_i32, %c0_i32_0 : i32, i32
  }
  func.func @transform_7(%arg0: i32) -> (i32, i32) {
    %c0_i32 = arith.constant 0 : i32
    %c0_i32_0 = arith.constant 0 : i32
    return %arg0, %c0_i32 : i32, i32
  }
}

</mosaic_0001>

<bundles_post_ra>
// kernel: reprogramming_layer_forward.3
= control target key start
LH: loop header
LB: loop body
LE: loop exit
PB: predicated region body
PF: predicated region fallthrough
CT: control target
= control target key end

     0   :  { %vm18_vm0 = vcmask 261120   ;;  %v97_v2 = vmov 0.0   ;;  %vm33_vm1 = vcmask 523264   ;;  %s163_s1 = inlined_call_operand.vmem [shape: f32[64,32], index: 1, kind: input, shape index: {}]   ;;  %s164_s2 = inlined_call_operand.vmem [shape: f32[1,32], index: 2, kind: input, shape index: {}]   ;;  %s165_s0 = inlined_call_operand.vmem [shape: f32[16,64], index: 0, kind: input, shape index: {}]   ;;  %s166_s3 = inlined_call_operand.vmem [shape: f32[16,32], index: 3, kind: output, shape index: {}]  }
   0x1   :  { %v32_v0 = vld [vmem:[%s163_s1 + $0x38] sm:$0xff]  ;;  %v31_v1 = vld [vmem:[%s163_s1 + $0x30] sm:$0xff]  ;;  %19 = vst.msk [vmem:[#allocation2] sm:$0xff] %vm18_vm0, %v97_v2  ;;  %v30_v3 = vld [vmem:[%s163_s1 + $0x28] sm:$0xff] }
   0x2   :  { %48 = vmatpush.msra.mxu0 %v32_v0  ;;  %87 = vmatpush.msra.mxu1 %v32_v0  ;;  %20 = vst.msk [vmem:[#allocation2 + $0x8] sm:$0xff] %vm18_vm0, %v97_v2  ;;  %v29_v4 = vld [vmem:[%s163_s1 + $0x20] sm:$0xff]  ;;  %v28_v5 = vld [vmem:[%s163_s1 + $0x18] sm:$0xff]  ;;  %v27_v6 = vld [vmem:[%s163_s1 + $0x10] sm:$0xff] }
   0x3   :  { %v26_v7 = vld [vmem:[%s163_s1 + $0x8] sm:$0xff]  ;;  %v25_v8 = vld [vmem:[%s163_s1] sm:$0xff] }
   0x4   :  { %49 = vmatpush.msra.mxu0 %v31_v1  ;;  %88 = vmatpush.msra.mxu1 %v31_v1  ;;  %v23_v9 = vld [vmem:[%s165_s0] sm:$0xff]  ;;  %v24_v10 = vld [vmem:[%s165_s0 + $0x8] sm:$0xff] }
   0x5   :  { %v96_v17 = vld [vmem:[%s164_s2] ss:$0 sm:$0xff] }
   0x6   :  { %50 = vmatpush.msra.mxu0 %v30_v3  ;;  %89 = vmatpush.msra.mxu1 %v30_v3 }
   0x8   :  { %51 = vmatpush.msra.mxu0 %v29_v4  ;;  %90 = vmatpush.msra.mxu1 %v29_v4  ;;  %v21_v11 = vld [vmem:[#allocation2] sm:$0xff] }
   0x9   :  { %v22_v12 = vld [vmem:[#allocation2 + $0x8] sm:$0xff] }
   0xa   :  { %52 = vmatpush.msra.mxu0 %v28_v5  ;;  %91 = vmatpush.msra.mxu1 %v28_v5 }
   0xc   :  { %53 = vmatpush.msra.mxu0 %v27_v6  ;;  %92 = vmatpush.msra.mxu1 %v27_v6 }
   0xe   :  { %54 = vmatpush.msra.mxu0 %v26_v7  ;;  %93 = vmatpush.msra.mxu1 %v26_v7 }
  0x10   :  { %55 = vmatpush.msra.mxu0 %v25_v8  ;;  %94 = vmatpush.msra.mxu1 %v25_v8 }
  0x11   :  { %85 = vmatmul.msk.f32.vlgmr.msra.gmra.mxu0 %vm33_vm1, %v23_v9  ;;  %86 = vmatmul.msk.f32.vlgmr.msra.gmra.mxu1 %vm33_vm1, %v24_v10 }
  0x8e   :  { %v57_v13 = vpop.f32.mrf.mxu0  ;;  %v60_v14 = vpop.f32.mrf.mxu1 }
  0x8f   :  { %v63_v15 = vadd.f32 %v57_v13, %v21_v11  ;;  %v64_v16 = vadd.f32 %v60_v14, %v22_v12 }
  0x91   :  { %66 = vst.msk [vmem:[#allocation2] sm:$0xff] %vm18_vm0, %v63_v15 }
  0x92   :  { %67 = vst.msk [vmem:[#allocation2 + $0x8] sm:$0xff] %vm18_vm0, %v64_v16 }
  0x98   :  { %v71_v18 = vld [vmem:[#allocation2] sm:$0xff] }
  0x99   :  { %v77_v19 = vadd.f32 %v96_v17, %v71_v18  ;;  %v72_v20 = vld [vmem:[#allocation2 + $0x8] sm:$0xff] }
  0x9a   :  { %v78_v21 = vadd.f32 %v96_v17, %v72_v20 }
  0x9b   :  { %79 = vst.msk [vmem:[%s166_s3] sm:$0xff] %vm18_vm0, %v77_v19 }
  0x9c   :  { %80 = vst.msk [vmem:[%s166_s3 + $0x8] sm:$0xff] %vm18_vm0, %v78_v21 }

// kernel: reprogramming_layer_forward.5
= control target key start
LH: loop header
LB: loop body
LE: loop exit
PB: predicated region body
PF: predicated region fallthrough
CT: control target
= control target key end

     0   :  { %s874_s0 = inlined_call_operand.vmem [shape: f32[16,32], index: 0, kind: input, shape index: {}]   ;;  %s875_s1 = inlined_call_operand.vmem [shape: f32[16,32], index: 1, kind: input, shape index: {}]   ;;  %s876_s2 = inlined_call_operand.vmem [shape: f32[16,32], index: 2, kind: input, shape index: {}]   ;;  %s877_s3 = inlined_call_operand.vmem [shape: f32[32,32], index: 3, kind: input, shape index: {}]   ;;  %s878_s4 = inlined_call_operand.vmem [shape: f32[1,32], index: 4, kind: input, shape index: {}]   ;;  %s879_s5 = inlined_call_operand.vmem [shape: f32[32,64], index: 5, kind: input, shape index: {}]   ;;  %s880_s6 = inlined_call_operand.vmem [shape: f32[1,64], index: 6, kind: input, shape index: {}]   ;;  %s881_s7 = inlined_call_operand.hbm [shape: f32[16,64], index: 7, kind: output, shape index: {}]  }
   0x1   :  { %v32_v0 = vld [vmem:[%s877_s3 + $0x18] sm:$0xff]  ;;  %v31_v1 = vld [vmem:[%s877_s3 + $0x10] sm:$0xff]  ;;  %v30_v2 = vld [vmem:[%s877_s3 + $0x8] sm:$0xff] }
   0x2   :  { %56 = vmatpush.msra.mxu0 %v32_v0  ;;  %610 = vmatpush.msra.mxu1 %v32_v0  ;;  %v759_v3 = vld [vmem:[%s875_s1 + $0x8] sm:$0xff] }
   0x4   :  { %57 = vmatpush.msra.mxu0 %v31_v1  ;;  %611 = vmatpush.msra.mxu1 %v31_v1 }
   0x5   :  { %12 = vsyncpa [#allocation5], 0  ;;  %v29_v4 = vld [vmem:[%s877_s3] sm:$0xff]  ;;  %s699_s11 = smov 120   ;;  %vm37_vm0 = vcmask 261120   ;;  %v28_v6 = vld [vmem:[%s874_s0 + $0x8] sm:$0xff] }
   0x6   :  { %181 = vrot.lane.b32.xlu1 %v759_v3, %s699_s11  ;;  %58 = vmatpush.msra.mxu0 %v30_v2  ;;  %v27_v5 = vld [vmem:[%s874_s0] sm:$0xff]  ;;  %s700_s17 = smov 104   ;;  %s701_s18 = smov 112   ;;  %vm75_vm1 = vcmask 64512   ;;  %vm111_vm2 = vcmask 130048   ;;  %v74_v41 = vld [vmem:[%s876_s2 + $0x8] sm:$0xff] }
   0x7   :  { %612 = vmatpush.msra.mxu1 %v30_v2  ;;  %v167_v7 = vld [vmem:[%s875_s1] sm:$0xff]  ;;  %154 = vmatpush.msra.mxu2 %v74_v41  ;;  %s703_s22 = smov 16   ;;  %s704_s23 = smov 24   ;;  %vm281_vm3 = vcmask 130112   ;;  %vm400_vm4 = vcmask 195712   ;;  %vm519_vm5 = vcmask 261312  }
   0x8   :  { %59 = vmatpush.msra.mxu0 %v29_v4  ;;  %v639_v8 = vld [vmem:[%s878_s4] ss:$0 sm:$0xff]  ;;  %614 = vmatpush.msra.mxu3 %v74_v41  ;;  %vm561_vm6 = vcmask 523264   ;;  %s705_s10 = smov [#allocation4]   ;;  %s570_s14 = sshll.u32 %s881_s7, 4  ;;  %s571_s14 = int_to_ptr.hbm [resolvable:$true] %s570_s14 }
   0x9   :  { %613 = vmatpush.msra.mxu1 %v29_v4  ;;  %582 = vmatmul.msk.f32.vlgmr.msra.gmra.mxu0 %vm37_vm0, %v27_v5  ;;  %v73_v42 = vld [vmem:[%s876_s2] sm:$0xff]  ;;  %s702_s2 = smov 8   ;;  %s706_s15 = smov 128  }
   0xa   :  { %583 = vmatmul.msk.f32.vlgmr.msra.gmra.mxu1 %vm37_vm0, %v28_v6  ;;  %155 = vmatpush.msra.mxu2 %v73_v42 }
   0xb   :  { %584 = vmatpush.xpose.msk.msrb.mxu1 %vm75_vm1, %v759_v3  ;;  %615 = vmatpush.msra.mxu3 %v73_v42 }
   0xe   :  { %179 = vrot.lane.b32.xlu1 %v167_v7, %s699_s11 }
   0xf   :  { %585 = vmatpush.xpose.msk.msrb.mxu1 %vm75_vm1, %v167_v7 }
  0x16   :  { %417 = vrot.lane.b32.xlu1 %v167_v7, %s700_s17 }
  0x1e   :  { %300 = vrot.lane.b32.xlu1 %v759_v3, %s701_s18 }
  0x78   :  { %v182_v15 = vpop.permute.xlu1 %181 }
  0x79   :  { %590 = vmatpush.xpose.msk.msrb.mxu3 %vm75_vm1, %v182_v15 }
  0x80   :  { %v180_v16 = vpop.permute.xlu1 %179 }
  0x81   :  { %591 = vmatpush.xpose.msk.msrb.mxu3 %vm75_vm1, %v180_v16 }
  0x86   :  { %v61_v9 = vpop.f32.mrf.mxu0 }
  0x87   :  { %v64_v10 = vpop.f32.mrf.mxu1  ;;  %v62_v11 = vadd.f32 %v639_v8, %v61_v9 }
  0x88   :  { %v65_v12 = vadd.f32 %v639_v8, %v64_v10  ;;  %v418_v17 = vpop.permute.xlu1 %417 }
  0x89   :  { %67 = vst.msk [vmem:[#allocation2] sm:$0xff] %vm37_vm0, %v62_v11 }
  0x8a   :  { %68 = vst.msk [vmem:[#allocation2 + $0x8] sm:$0xff] %vm37_vm0, %v65_v12 }
  0x90   :  { %v165_v13 = vld [vmem:[#allocation2] sm:$0xff]  ;;  %v301_v18 = vpop.permute.xlu1 %300 }
  0x91   :  { %173 = vrot.lane.b32.xlu2 %v165_v13, %s699_s11  ;;  %586 = vmatmul.msk.f32.vlgmr.msrb.gmra.mxu1 %vm75_vm1, %v165_v13  ;;  %v404_v14 = vld [vmem:[#allocation2 + $0x8] sm:$0xff] }
  0x92   :  { %413 = vrot.lane.b32.xlu1 %v404_v14, %s700_s17  ;;  %596 = vmatpush.xpose.msk.msrb.mxu0 %vm75_vm1, %v301_v18 }
  0x99   :  { %175 = vrot.lane.b32.xlu2 %v404_v14, %s699_s11  ;;  %587 = vmatmul.msk.f32.gmra.mxu1 %vm75_vm1, %v404_v14 }
  0xa1   :  { %411 = vrot.lane.b32.xlu2 %v165_v13, %s700_s17 }
  0xa9   :  { %298 = vrot.lane.b32.xlu2 %v167_v7, %s701_s18 }
  0xb1   :  { %292 = vrot.lane.b32.xlu2 %v165_v13, %s701_s18 }
  0xeb   :  { %v174_v19 = vpop.permute.xlu2 %173 }
  0xf3   :  { %v176_v20 = vpop.permute.xlu2 %175 }
  0xfb   :  { %v412_v21 = vpop.permute.xlu2 %411 }
 0x103   :  { %v299_v22 = vpop.permute.xlu2 %298 }
 0x104   :  { %597 = vmatpush.xpose.msk.msrb.mxu0 %vm75_vm1, %v299_v22  ;;  %v414_v28 = vpop.permute.xlu1 %413 }
 0x10b   :  { %v293_v23 = vpop.permute.xlu2 %292 }
 0x10c   :  { %598 = vmatmul.msk.f32.vlgmr.msrb.gmra.mxu0 %vm75_vm1, %v293_v23 }
 0x10e   :  { %v105_v24 = vpop.f32.mrf.mxu1 }
 0x10f   :  { %v112_v25 = vsel %vm111_vm2, %v105_v24, -inf }
 0x110   :  { %113 = vmax.xlane.f32.xlu1 %v112_v25 }
 0x116   :  { %v108_v26 = vpop.f32.mrf.mxu1 }
 0x117   :  { %v115_v27 = vsel %vm111_vm2, %v108_v26, -inf }
 0x118   :  { %116 = vmax.xlane.f32.xlu0 %v115_v27 }
 0x183   :  { %v114_v29 = vpop.xlane.xlu1 %113 }
 0x184   :  { %v118_v30 = vsub.f32 %v105_v24, %v114_v29 }
 0x186   :  { %v120_v31 = vmul.f32 1.442695, %v118_v30 }
 0x188   :  { %641 = vpow2.f32 %v120_v31 }
 0x189   :  { %v802_v32 = vpop.f32.mrf.mxu0 }
 0x18a   :  { %v333_v33 = vsel %vm111_vm2, %v802_v32, -inf }
 0x18b   :  { %334 = vmax.xlane.f32.xlu1 %v333_v33  ;;  %v117_v34 = vpop.xlane.xlu0 %116 }
 0x18c   :  { %v119_v35 = vsub.f32 %v108_v26, %v117_v34 }
 0x18e   :  { %v122_v36 = vmul.f32 1.442695, %v119_v35  ;;  %v642_v37 = vpop.eup %641 }
 0x18f   :  { %v124_v38 = vsel %vm111_vm2, %v642_v37, 0.0 }
 0x190   :  { %643 = vpow2.f32 %v122_v36 }
 0x193   :  { %125 = vadd.xlane.f32.xlu1 %v124_v38 }
 0x196   :  { %v644_v39 = vpop.eup %643 }
 0x197   :  { %v127_v40 = vsel %vm111_vm2, %v644_v39, 0.0 }
 0x198   :  { %128 = vadd.xlane.f32.xlu0 %v127_v40 }
 0x1ac   :  { %419 = vrot.lane.b32.xlu0 %v759_v3, %s700_s17  ;;  %v624_v3 = vpack.i.bf16 %v73_v42, %v74_v41 }
 0x1b4   :  { %294 = vrot.lane.b32.xlu0 %v404_v14, %s701_s18 }
 0x1fe   :  { %v335_v43 = vpop.xlane.xlu1 %334 }
 0x1ff   :  { %v339_v7 = vsub.f32 %v802_v32, %v335_v43 }
 0x201   :  { %v341_v10 = vmul.f32 1.442695, %v339_v7 }
 0x206   :  { %v126_v44 = vpop.xlane.xlu1 %125 }
 0x207   :  { %645 = vrcp.f32 %v126_v44 }
 0x20b   :  { %v129_v45 = vpop.xlane.xlu0 %128 }
 0x20c   :  { %647 = vrcp.f32 %v129_v45 }
 0x20d   :  { %v646_v46 = vpop.eup %645 }
 0x20e   :  { %v132_v47 = vmul.f32 %v646_v46, %v642_v37 }
 0x210   :  { %588 = vmatmul.msk.f32.vlgmr.msra.gmra.mxu2 %vm111_vm2, %v132_v47 }
 0x212   :  { %v648_v48 = vpop.eup %647 }
 0x213   :  { %v133_v49 = vmul.f32 %v648_v48, %v644_v39 }
 0x215   :  { %589 = vmatmul.msk.f32.vlgmr.msra.gmra.mxu3 %vm111_vm2, %v133_v49 }
 0x21d   :  { %592 = vmatmul.msk.f32.vlgmr.msrb.gmra.mxu3 %vm75_vm1, %v174_v19 }
 0x21e   :  { %v420_v50 = vpop.permute.xlu0 %419 }
 0x21f   :  { %602 = vmatpush.xpose.msk.msra.mxu3 %vm75_vm1, %v420_v50 }
 0x223   :  { %603 = vmatpush.xpose.msk.msra.mxu3 %vm75_vm1, %v418_v17 }
 0x225   :  { %593 = vmatmul.msk.f32.gmra.mxu3 %vm75_vm1, %v176_v20 }
 0x226   :  { %v295_v51 = vpop.permute.xlu0 %294 }
 0x227   :  { %599 = vmatmul.msk.f32.gmra.mxu0 %vm75_vm1, %v295_v51 }
 0x22d   :  { %604 = vmatmul.msk.f32.vlgmr.msra.gmra.mxu3 %vm75_vm1, %v412_v21 }
 0x235   :  { %605 = vmatmul.msk.f32.gmra.mxu3 %vm75_vm1, %v414_v28 }
 0x293   :  { %v157_v52 = vpop.f32.mrf.mxu2 }
 0x294   :  { %163 = vst.msk [vmem:[#allocation3] sm:$0xff] %vm75_vm1, %v157_v52 }
 0x298   :  { %v160_v53 = vpop.f32.mrf.mxu3 }
 0x299   :  { %164 = vst.msk [vmem:[#allocation3 + $0x8] sm:$0xff] %vm75_vm1, %v160_v53 }
 0x2a0   :  { %v208_v54 = vpop.f32.mrf.mxu3 }
 0x2a1   :  { %v214_v55 = vsel %vm111_vm2, %v208_v54, -inf }
 0x2a2   :  { %215 = vmax.xlane.f32.xlu2 %v214_v55 }
 0x2a4   :  { %v330_v60 = vpop.f32.mrf.mxu0 }
 0x2a5   :  { %v336_v63 = vsel %vm111_vm2, %v330_v60, -inf }
 0x2a8   :  { %v211_v56 = vpop.f32.mrf.mxu3 }
 0x2a9   :  { %v217_v57 = vsel %vm111_vm2, %v211_v56, -inf }
 0x2aa   :  { %218 = vmax.xlane.f32.xlu0 %v217_v57 }
 0x2b0   :  { %v446_v58 = vpop.f32.mrf.mxu3 }
 0x2b1   :  { %v452_v59 = vsel %vm111_vm2, %v446_v58, -inf }
 0x2b2   :  { %453 = vmax.xlane.f32.xlu2 %v452_v59 }
 0x2b8   :  { %v449_v61 = vpop.f32.mrf.mxu3 }
 0x2b9   :  { %v455_v62 = vsel %vm111_vm2, %v449_v61, -inf }
 0x2ba   :  { %456 = vmax.xlane.f32.xlu0 %v455_v62  ;;  %337 = vmax.xlane.f32.xlu2 %v336_v63 }
 0x2d2   :  { %625 = vrot.lane.b32.xlu2 %v624_v3, %s699_s11  ;;  %s568_s11 = sshll.u32 %s705_s10, 4  ;;  %s569_s11 = int_to_ptr.vmem [resolvable:$true] %s568_s11 }
 0x2da   :  { %635 = vrot.lane.b32.xlu2 %v624_v3, %s701_s18 }
 0x315   :  { %v216_v0 = vpop.xlane.xlu2 %215 }
 0x316   :  { %v220_v1 = vsub.f32 %v208_v54, %v216_v0 }
 0x318   :  { %v222_v2 = vmul.f32 1.442695, %v220_v1  ;;  %v527_v1 = vld [vmem:[%s879_s5 + $0x18] sm:$0xff] }
 0x319   :  { %550 = vmatpush.msra.mxu0 %v527_v1 }
 0x31a   :  { %649 = vpow2.f32 %v222_v2  ;;  %v526_v2 = vld [vmem:[%s879_s5 + $0x10] sm:$0xff] }
 0x31b   :  { %551 = vmatpush.msra.mxu0 %v526_v2 }
 0x31d   :  { %v219_v4 = vpop.xlane.xlu0 %218 }
 0x31e   :  { %v221_v5 = vsub.f32 %v211_v56, %v219_v4  ;;  %v524_v4 = vld [vmem:[%s879_s5] sm:$0xff] }
 0x320   :  { %v650_v6 = vpop.eup %649  ;;  %v224_v8 = vmul.f32 1.442695, %v221_v5 }
 0x321   :  { %v226_v9 = vsel %vm111_vm2, %v650_v6, 0.0 }
 0x322   :  { %651 = vpow2.f32 %v224_v8  ;;  %227 = vadd.xlane.f32.xlu0 %v226_v9 }
 0x323   :  { %653 = vpow2.f32 %v341_v10 }
 0x325   :  { %v454_v11 = vpop.xlane.xlu2 %453 }
 0x326   :  { %v458_v12 = vsub.f32 %v446_v58, %v454_v11  ;;  %v640_v11 = vld [vmem:[%s880_s6] ss:$0 sm:$0xff] }
 0x328   :  { %v652_v13 = vpop.eup %651  ;;  %v460_v14 = vmul.f32 1.442695, %v458_v12 }
 0x329   :  { %v229_v15 = vsel %vm111_vm2, %v652_v13, 0.0  ;;  %v654_v17 = vpop.eup %653 }
 0x32a   :  { %655 = vpow2.f32 %v460_v14  ;;  %230 = vadd.xlane.f32.xlu1 %v229_v15  ;;  %v345_v24 = vsel %vm111_vm2, %v654_v17, 0.0 }
 0x32d   :  { %v457_v16 = vpop.xlane.xlu0 %456  ;;  %v338_v18 = vpop.xlane.xlu2 %337 }
 0x32e   :  { %v459_v19 = vsub.f32 %v449_v61, %v457_v16  ;;  %v340_v22 = vsub.f32 %v330_v60, %v338_v18 }
 0x330   :  { %v656_v20 = vpop.eup %655  ;;  %v462_v21 = vmul.f32 1.442695, %v459_v19  ;;  %v343_v25 = vmul.f32 1.442695, %v340_v22 }
 0x331   :  { %v464_v23 = vsel %vm111_vm2, %v656_v20, 0.0 }
 0x332   :  { %465 = vadd.xlane.f32.xlu0 %v464_v23  ;;  %346 = vadd.xlane.f32.xlu1 %v345_v24  ;;  %657 = vpow2.f32 %v462_v21 }
 0x333   :  { %659 = vpow2.f32 %v343_v25 }
 0x335   :  { %v626_v30 = vpop.permute.xlu2 %625 }
 0x336   :  { %v627_v31 = vunpack.i.l.bf16 %v626_v30  ;;  %v628_v32 = vunpack.i.h.bf16 %v626_v30 }
 0x338   :  { %v658_v26 = vpop.eup %657  ;;  %264 = vmatpush.msrb.mxu2 %v627_v31 }
 0x339   :  { %v467_v27 = vsel %vm111_vm2, %v658_v26, 0.0  ;;  %v660_v28 = vpop.eup %659 }
 0x33a   :  { %468 = vadd.xlane.f32.xlu1 %v467_v27  ;;  %v348_v29 = vsel %vm111_vm2, %v660_v28, 0.0  ;;  %265 = vmatpush.msrb.mxu2 %v628_v32 }
 0x33d   :  { %v636_v33 = vpop.permute.xlu2 %635 }
 0x33e   :  { %v637_v34 = vunpack.i.l.bf16 %v636_v33  ;;  %v638_v35 = vunpack.i.h.bf16 %v636_v33 }
 0x340   :  { %383 = vmatpush.msra.mxu1 %v637_v34 }
 0x342   :  { %349 = vadd.xlane.f32.xlu1 %v348_v29  ;;  %384 = vmatpush.msra.mxu1 %v638_v35 }
 0x346   :  { %630 = vrot.lane.b32.xlu0 %v624_v3, %s700_s17  ;;  %v525_v3 = vld [vmem:[%s879_s5 + $0x8] sm:$0xff] }
 0x347   :  { %552 = vmatpush.msra.mxu0 %v525_v3 }
 0x349   :  { %553 = vmatpush.msra.mxu0 %v524_v4 }
 0x395   :  { %v228_v36 = vpop.xlane.xlu0 %227 }
 0x396   :  { %661 = vrcp.f32 %v228_v36 }
 0x39c   :  { %v662_v37 = vpop.eup %661 }
 0x39d   :  { %v231_v38 = vpop.xlane.xlu1 %230  ;;  %v234_v39 = vmul.f32 %v662_v37, %v650_v6 }
 0x39e   :  { %663 = vrcp.f32 %v231_v38 }
 0x39f   :  { %594 = vmatmul.msk.f32.vlgmr.msrb.gmra.mxu2 %vm111_vm2, %v234_v39 }
 0x3a4   :  { %v664_v40 = vpop.eup %663 }
 0x3a5   :  { %v347_v41 = vpop.xlane.xlu1 %346  ;;  %v235_v42 = vmul.f32 %v664_v40, %v652_v13  ;;  %v466_v46 = vpop.xlane.xlu0 %465 }
 0x3a6   :  { %665 = vrcp.f32 %v347_v41 }
 0x3a7   :  { %595 = vmatmul.msk.f32.gmra.mxu2 %vm111_vm2, %v235_v42  ;;  %667 = vrcp.f32 %v466_v46 }
 0x3ac   :  { %v666_v43 = vpop.eup %665 }
 0x3ad   :  { %v353_v44 = vmul.f32 %v666_v43, %v654_v17  ;;  %v469_v45 = vpop.xlane.xlu1 %468  ;;  %v668_v49 = vpop.eup %667 }
 0x3ae   :  { %v472_v52 = vmul.f32 %v668_v49, %v656_v20 }
 0x3af   :  { %600 = vmatmul.msk.f32.vlgmr.msra.gmra.mxu1 %vm111_vm2, %v353_v44 }
 0x3b5   :  { %v350_v47 = vpop.xlane.xlu1 %349 }
 0x3b6   :  { %669 = vrcp.f32 %v350_v47 }
 0x3b7   :  { %671 = vrcp.f32 %v469_v45 }
 0x3b8   :  { %v631_v48 = vpop.permute.xlu0 %630 }
 0x3b9   :  { %v632_v50 = vunpack.i.l.bf16 %v631_v48  ;;  %v633_v51 = vunpack.i.h.bf16 %v631_v48 }
 0x3bb   :  { %502 = vmatpush.msra.mxu2 %v632_v50 }
 0x3bc   :  { %v670_v53 = vpop.eup %669 }
 0x3bd   :  { %503 = vmatpush.msra.mxu2 %v633_v51  ;;  %v354_v54 = vmul.f32 %v670_v53, %v660_v28  ;;  %v672_v55 = vpop.eup %671 }
 0x3be   :  { %606 = vmatmul.msk.f32.vlgmr.msra.gmra.mxu2 %vm111_vm2, %v472_v52  ;;  %v473_v56 = vmul.f32 %v672_v55, %v658_v26 }
 0x3bf   :  { %601 = vmatmul.msk.f32.gmra.mxu1 %vm111_vm2, %v354_v54 }
 0x3c6   :  { %607 = vmatmul.msk.f32.gmra.mxu2 %vm111_vm2, %v473_v56 }
 0x422   :  { %v267_v57 = vpop.f32.mrf.mxu2 }
 0x423   :  { %275 = vrot.lane.b32.xlu2 %v267_v57, %s702_s2 }
 0x42a   :  { %v270_v58 = vpop.f32.mrf.mxu2 }
 0x42b   :  { %277 = vrot.lane.b32.xlu2 %v270_v58, %s702_s2 }
 0x42c   :  { %v386_v59 = vpop.f32.mrf.mxu1 }
 0x42d   :  { %394 = vrot.lane.b32.xlu0 %v386_v59, %s703_s22 }
 0x43c   :  { %v389_v60 = vpop.f32.mrf.mxu1 }
 0x43d   :  { %396 = vrot.lane.b32.xlu0 %v389_v60, %s703_s22 }
 0x441   :  { %v505_v61 = vpop.f32.mrf.mxu2 }
 0x442   :  { %513 = vrot.lane.b32.xlu1 %v505_v61, %s704_s23 }
 0x449   :  { %v508_v62 = vpop.f32.mrf.mxu2 }
 0x44a   :  { %515 = vrot.lane.b32.xlu2 %v508_v62, %s704_s23 }
 0x47d   :  { %v276_v63 = vpop.permute.xlu2 %275 }
 0x47e   :  { %282 = vst.msk [vmem:[#allocation3] sm:$0xff] %vm281_vm3, %v276_v63 }
 0x485   :  { %v278_v0 = vpop.permute.xlu2 %277 }
 0x486   :  { %283 = vst.msk [vmem:[#allocation3 + $0x8] sm:$0xff] %vm281_vm3, %v278_v0 }
 0x49f   :  { %v395_v5 = vpop.permute.xlu0 %394 }
 0x4a0   :  { %401 = vst.msk [vmem:[#allocation3] sm:$0xff] %vm400_vm4, %v395_v5 }
 0x4a4   :  { %v516_v7 = vpop.permute.xlu2 %515 }
 0x4af   :  { %v397_v6 = vpop.permute.xlu0 %396 }
 0x4b0   :  { %402 = vst.msk [vmem:[#allocation3 + $0x8] sm:$0xff] %vm400_vm4, %v397_v6 }
 0x4b1   :  { %521 = vst.msk [vmem:[#allocation3 + $0x8] sm:$0xff] %vm519_vm5, %v516_v7 }
 0x4b4   :  { %v514_v8 = vpop.permute.xlu1 %513 }
 0x4b5   :  { %520 = vst.msk [vmem:[#allocation3] sm:$0xff] %vm519_vm5, %v514_v8 }
 0x4b8   :  { %v523_v10 = vld [vmem:[#allocation3 + $0x8] sm:$0xff] }
 0x4bc   :  { %v522_v9 = vld [vmem:[#allocation3] sm:$0xff] }
 0x4bd   :  { %608 = vmatmul.msk.f32.vlgmr.msra.gmra.mxu0 %vm37_vm0, %v522_v9 }
 0x4c5   :  { %609 = vmatmul.msk.f32.gmra.mxu0 %vm37_vm0, %v523_v10 }
 0x53a   :  { %v555_v12 = vpop.f32.mrf.mxu0 }
 0x53b   :  { %v556_v13 = vadd.f32 %v640_v11, %v555_v12 }
 0x53d   :  { %562 = vst.msk [vmem:[#allocation4] sm:$0xff] %vm561_vm6, %v556_v13 }
 0x542   :  { %v558_v14 = vpop.f32.mrf.mxu0 }
 0x543   :  { %v559_v15 = vadd.f32 %v640_v11, %v558_v14 }
 0x545   :  { %563 = vst.msk [vmem:[#allocation4 + $0x8] sm:$0xff] %vm561_vm6, %v559_v15 }
 0x546   :  { %576 = dma.vmem_to_hbm [thread:$0]  %s569_s11, 256, %s571_s14, [#allocation5], %s706_s15, %s706_s15, %s702_s2  }
 0x547   :  { %697 = dma.done.wait [#allocation5], 256  }
 0x548   :  { %698 = vsyncadd [#allocation5], 4294967040 }
 0x549   :  { %581 = vsyncpa [#allocation5], 1 }

</bundles_post_ra>
